<compile_context>
chip_gen: v5e
topology: v5e:2x2
jax: 0.10.0
libtpu: 0.0.40
codegen_flags: <defaults>
</compile_context>

<pallas_src>
import numpy as np

import jax
import jax.numpy as jnp
from jax.experimental import pallas as pl
from jax.experimental.pallas import tpu as pltpu


def _round_up(x, m):
    return (x + m - 1) // m * m


def _cdiv(a, b):
    return (a + b - 1) // b


def _pick_batch_tiling(batch, tb_target):
    """Batch tile (tb), padded batch (bp) and grid length.

    - tiny batches: one tile of round_up(B, 8) rows (no wasteful padding to 256)
    - large batches: split into an even number of tiles so the ("parallel",) grid
      axis keeps both v7x TensorCores busy, with each tile <= tb_target rows.
    """
    bp8 = _round_up(batch, 8)
    n_tiles = _cdiv(bp8, tb_target)
    if n_tiles > 1:
        n_tiles = 2 * _cdiv(n_tiles, 2)          # even #steps for v7x megacore
    tb = _round_up(_cdiv(bp8, n_tiles), 8)
    return tb, tb * n_tiles, n_tiles


def _build_tap_matrix(conv_w, C, H, W, chwp, hwp):
    """Host-side, one-time: (chwp, hwp) matrix T with
       flatten(conv2d(x, 3x3, SAME))[b, :] == x.reshape(B, C*H*W)[b, :] @ T[: C*H*W, : H*W].
    Boundary zeros in T encode the SAME padding; extra rows/cols are zero padding
    to lane-aligned sizes."""
    cw = np.asarray(conv_w, dtype=np.float32).reshape(C, 3, 3)
    T = np.zeros((chwp, hwp), dtype=np.float32)
    ii, jj = np.meshgrid(np.arange(H), np.arange(W), indexing="ij")
    out_idx = (ii * W + jj).ravel()
    for c in range(C):
        for kh in range(3):
            for kw in range(3):
                si = ii + kh - 1
                sj = jj + kw - 1
                valid = ((si >= 0) & (si < H) & (sj >= 0) & (sj < W)).ravel()
                in_idx = (c * H * W + si * W + sj).ravel()[valid]
                T[in_idx, out_idx[valid]] = cw[c, kh, kw]
    return T


def covers_genre_tanh_kernel(bc_ref,             # SMEM: conv bias (1,)
                             x_ref,              # VMEM: (tb, chwp) raw flattened image rows
                             tap_ref,            # VMEM: (chwp, hwp) conv-as-matmul tap matrix
                             w0_ref, b0_ref,     # VMEM: (hwp, hid_p), (1, hid_p)
                             w1_ref, b1_ref,     # VMEM: (hid_p, out_p), (1, out_p) pad=-1e30
                             out_ref):           # VMEM: (tb, out_p) log-probs (lane-padded)
    # Conv2d(3 -> 1, 3x3, SAME) as a single MXU matmul over the tap matrix.
    conv = jnp.dot(x_ref[...], tap_ref[...], preferred_element_type=jnp.float32)
    # conv bias + ReLU.  Padded feature lanes may become relu(bias) != 0, but the
    # corresponding w0 rows are zero so they never reach the hidden layer.
    feat = jnp.maximum(conv + bc_ref[0], 0.0)                       # (tb, hwp)

    # linear0 -> (dropout = identity at eval) -> tanh.  Padded hidden lanes stay 0.
    h = jnp.tanh(jnp.dot(feat, w0_ref[...],
                         preferred_element_type=jnp.float32) + b0_ref[...])

    # linear -> log_softmax.  Padded logit lanes carry -1e30 (from padded bias with
    # zero w1 columns), so they never win the max and contribute 0 to the exp-sum.
    logits = jnp.dot(h, w1_ref[...],
                     preferred_element_type=jnp.float32) + b1_ref[...]
    m = jnp.max(logits, axis=-1, keepdims=True)
    lse = m + jnp.log(jnp.sum(jnp.exp(logits - m), axis=-1, keepdims=True))
    out_ref[...] = logits - lse                                      # lane-dense store


def make_covers_genre_tanh_forward(conv_w, conv_b, w0, b0, w1, b1, *,
                                   H, W, tb_target=256):
    """One-time weight preprocessing; returns a jitted forward(x) -> (B, out) log-probs.

    conv_w: (1, 3, 3, 3), conv_b: (1,).  w0: (H*W, hidden), w1: (hidden, out)
    stored pre-transposed (i.e. y @ w).  Use tb_target=128 on v5e, 256 on v6e/v7x.
    """
    C = 3
    HW = H * W
    hidden = int(w0.shape[1])
    out_dim = int(w1.shape[1])

    chwp = _round_up(C * HW, 128)        # 768 for 3x16x16
    hwp = _round_up(HW, 128)             # 256 for 16x16
    hid_p = _round_up(hidden, 128)
    out_p = _round_up(out_dim, 128)
    NEG = np.float32(-1e30)

    # ---- one-time host-side preprocessing (hoisted out of the per-call path) ----
    tap = jnp.asarray(_build_tap_matrix(conv_w, C, H, W, chwp, hwp))
    bc = jnp.asarray(np.asarray(conv_b, np.float32).reshape(1))

    w0_p = np.zeros((hwp, hid_p), np.float32)
    w0_p[:HW, :hidden] = np.asarray(w0, np.float32)
    b0_p = np.zeros((1, hid_p), np.float32)
    b0_p[0, :hidden] = np.asarray(b0, np.float32)

    w1_p = np.zeros((hid_p, out_p), np.float32)
    w1_p[:hidden, :out_dim] = np.asarray(w1, np.float32)
    b1_p = np.full((1, out_p), NEG, np.float32)
    b1_p[0, :out_dim] = np.asarray(b1, np.float32)

    w0_p, b0_p, w1_p, b1_p = map(jnp.asarray, (w0_p, b0_p, w1_p, b1_p))

    def forward(x):
        B = x.shape[0]
        assert x.shape[1:] == (C, H, W)
        tb, bp, n_tiles = _pick_batch_tiling(B, tb_target)

        # Raw flattened image rows: free NCHW reshape + batch/lane zero pad only.
        xf = x.reshape(B, C * HW).astype(jnp.float32)
        xf = jnp.pad(xf, ((0, bp - B), (0, chwp - C * HW)))

        out = pl.pallas_call(
            covers_genre_tanh_kernel,
            out_shape=jax.ShapeDtypeStruct((bp, out_p), jnp.float32),
            grid=(n_tiles,),
            in_specs=[
                pl.BlockSpec(memory_space=pltpu.SMEM),            # conv bias (scalar)
                # Image rows: pipelined HBM->VMEM per grid step.  On v5e, if the
                # DMA ever becomes exposed, add pipeline_mode=pl.Buffered(3) here.
                pl.BlockSpec((tb, chwp), lambda i: (i, 0)),
                pl.BlockSpec((chwp, hwp), lambda i: (0, 0)),      # tap matrix (resident)
                pl.BlockSpec((hwp, hid_p), lambda i: (0, 0)),     # w0 (resident)
                pl.BlockSpec((1, hid_p), lambda i: (0, 0)),       # b0
                pl.BlockSpec((hid_p, out_p), lambda i: (0, 0)),   # w1
                pl.BlockSpec((1, out_p), lambda i: (0, 0)),       # b1 (+ -inf mask lanes)
            ],
            out_specs=pl.BlockSpec((tb, out_p), lambda i: (i, 0)),
            compiler_params=pltpu.CompilerParams(
                dimension_semantics=("parallel",)),
        )(bc, xf, tap, w0_p, b0_p, w1_p, b1_p)

        return out[:B, :out_dim]

    return jax.jit(forward)


def reference_forward(x, conv_w, conv_b, w0, b0, w1, b1):
    """Pure-JAX reference (matches the PyTorch module in eval mode)."""
    hi = jax.lax.Precision.HIGHEST
    y = jax.lax.conv_general_dilated(
        x, conv_w, window_strides=(1, 1), padding="SAME",
        dimension_numbers=("NCHW", "OIHW", "NCHW"), precision=hi)
    y = y[:, 0] + conv_b[0]                                   # (B, H, W)
    y = jnp.maximum(y, 0.0).reshape(x.shape[0], -1)
    h = jnp.tanh(jnp.dot(y, w0, precision=hi) + b0)
    logits = jnp.dot(h, w1, precision=hi) + b1
    return jax.nn.log_softmax(logits, axis=-1)


if __name__ == "__main__":
    # Small deterministic setup consistent with the module:
    #   outputsize=8, xdim=ydim=16, hidden=32, batch=2, 3 input channels.
    B, C, H, W = 2, 3, 16, 16
    HIDDEN, OUT = 32, 8

    key = jax.random.PRNGKey(0)
    k_x, k_cw, k_cb, k_w0, k_b0, k_w1, k_b1, k_xb = jax.random.split(key, 8)

    x = jax.random.normal(k_x, (B, C, H, W), dtype=jnp.float32)

    # Deterministic synthetic parameters (linear weights stored pre-transposed).
    conv_w = 0.1 * jax.random.normal(k_cw, (1, C, 3, 3), dtype=jnp.float32)
    conv_b = 0.1 * jax.random.normal(k_cb, (1,), dtype=jnp.float32)
    w0 = 0.1 * jax.random.normal(k_w0, (H * W, HIDDEN), dtype=jnp.float32)
    b0 = 0.1 * jax.random.normal(k_b0, (HIDDEN,), dtype=jnp.float32)
    w1 = 0.2 * jax.random.normal(k_w1, (HIDDEN, OUT), dtype=jnp.float32)
    b1 = 0.2 * jax.random.normal(k_b1, (OUT,), dtype=jnp.float32)

    # Weight preprocessing happens once here, outside the per-call path.
    fwd = make_covers_genre_tanh_forward(conv_w, conv_b, w0, b0, w1, b1,
                                         H=H, W=W, tb_target=256)

    # --- tiny batch (the module's nominal test shape) ---
    out = jax.block_until_ready(fwd(x))
    assert out.shape == (B, OUT)
    assert jnp.allclose(jnp.sum(jnp.exp(out), axis=1), 1.0, atol=1e-4)
    ref = reference_forward(x, conv_w, conv_b, w0, b0, w1, b1)
    assert jnp.allclose(out, ref, atol=2e-3, rtol=2e-3), float(jnp.max(jnp.abs(out - ref)))

    # --- larger batch exercising tb=256 tiles and a multi-step ("parallel",) grid ---
    BB = 512
    xb = jax.random.normal(k_xb, (BB, C, H, W), dtype=jnp.float32)
    outb = jax.block_until_ready(fwd(xb))
    refb = reference_forward(xb, conv_w, conv_b, w0, b0, w1, b1)
    assert outb.shape == (BB, OUT)
    assert jnp.allclose(jnp.sum(jnp.exp(outb), axis=1), 1.0, atol=1e-4)
    assert jnp.allclose(outb, refb, atol=2e-3, rtol=2e-3), float(jnp.max(jnp.abs(outb - refb)))

    print("KERNEL_OK")
</pallas_src>

<mosaic_0001>
module attributes {stable_mosaic.version = 11 : i64} {
  func.func @covers_genre_tanh_kernel(%arg0: i32, %arg1: memref<1xf32, #tpu.memory_space<smem>>, %arg2: memref<8x768xf32, #tpu.memory_space<vmem>>, %arg3: memref<768x256xf32, #tpu.memory_space<vmem>>, %arg4: memref<256x128xf32, #tpu.memory_space<vmem>>, %arg5: memref<1x128xf32, #tpu.memory_space<vmem>>, %arg6: memref<128x128xf32, #tpu.memory_space<vmem>>, %arg7: memref<1x128xf32, #tpu.memory_space<vmem>>, %arg8: memref<8x128xf32, #tpu.memory_space<vmem>>) attributes {dimension_semantics = [#tpu.dimension_semantics<parallel>], iteration_bounds = array<i64: 1>, scalar_prefetch = 0 : i64, scratch_operands = 0 : i64, tpu.core_type = #tpu.core_type<tc>, window_params = [{transform_indices = @transform_0, window_bounds = array<i64: 1>}, {transform_indices = @transform_1, window_bounds = array<i64: 8, 768>}, {pipeline_mode = #tpu.pipeline_mode<synchronous>, transform_indices = @transform_2, window_bounds = array<i64: 768, 256>}, {pipeline_mode = #tpu.pipeline_mode<synchronous>, transform_indices = @transform_3, window_bounds = array<i64: 256, 128>}, {pipeline_mode = #tpu.pipeline_mode<synchronous>, transform_indices = @transform_4, window_bounds = array<i64: 1, 128>}, {pipeline_mode = #tpu.pipeline_mode<synchronous>, transform_indices = @transform_5, window_bounds = array<i64: 128, 128>}, {pipeline_mode = #tpu.pipeline_mode<synchronous>, transform_indices = @transform_6, window_bounds = array<i64: 1, 128>}, {transform_indices = @transform_7, window_bounds = array<i64: 8, 128>}]} {
    %c0 = arith.constant 0 : index
    %c0_0 = arith.constant 0 : index
    %0 = vector.load %arg2[%c0, %c0_0] : memref<8x768xf32, #tpu.memory_space<vmem>>, vector<8x768xf32>
    %c0_1 = arith.constant 0 : index
    %c0_2 = arith.constant 0 : index
    %1 = vector.load %arg3[%c0_1, %c0_2] : memref<768x256xf32, #tpu.memory_space<vmem>>, vector<768x256xf32>
    %cst = arith.constant dense<0.000000e+00> : vector<8x256xf32>
    %2 = tpu.matmul %0, %1, %cst {dimension_numbers = #tpu.dot_dimension_numbers<[1], [0], [0], [1], [0, 0, 1, 1], [], []>} : vector<8x768xf32>, vector<768x256xf32>, vector<8x256xf32> -> vector<8x256xf32>
    %c0_3 = arith.constant 0 : index
    %3 = memref.load %arg1[%c0_3] : memref<1xf32, #tpu.memory_space<smem>>
    %4 = vector.broadcast %3 : f32 to vector<8x256xf32>
    %5 = arith.addf %2, %4 : vector<8x256xf32>
    %cst_4 = arith.constant 0.000000e+00 : f32
    %6 = vector.broadcast %cst_4 : f32 to vector<8x256xf32>
    %7 = arith.maximumf %5, %6 : vector<8x256xf32>
    %c0_5 = arith.constant 0 : index
    %c0_6 = arith.constant 0 : index
    %8 = vector.load %arg4[%c0_5, %c0_6] : memref<256x128xf32, #tpu.memory_space<vmem>>, vector<256x128xf32>
    %cst_7 = arith.constant dense<0.000000e+00> : vector<8x128xf32>
    %9 = tpu.matmul %7, %8, %cst_7 {dimension_numbers = #tpu.dot_dimension_numbers<[1], [0], [0], [1], [0, 0, 1, 1], [], []>} : vector<8x256xf32>, vector<256x128xf32>, vector<8x128xf32> -> vector<8x128xf32>
    %c0_8 = arith.constant 0 : index
    %c0_9 = arith.constant 0 : index
    %10 = vector.load %arg5[%c0_8, %c0_9] : memref<1x128xf32, #tpu.memory_space<vmem>>, vector<1x128xf32>
    %11 = vector.broadcast %10 : vector<1x128xf32> to vector<8x128xf32>
    %12 = arith.addf %9, %11 : vector<8x128xf32>
    %13 = math.tanh %12 : vector<8x128xf32>
    %c0_10 = arith.constant 0 : index
    %c0_11 = arith.constant 0 : index
    %14 = vector.load %arg6[%c0_10, %c0_11] : memref<128x128xf32, #tpu.memory_space<vmem>>, vector<128x128xf32>
    %cst_12 = arith.constant dense<0.000000e+00> : vector<8x128xf32>
    %15 = tpu.matmul %13, %14, %cst_12 {dimension_numbers = #tpu.dot_dimension_numbers<[1], [0], [0], [1], [0, 0, 1, 1], [], []>} : vector<8x128xf32>, vector<128x128xf32>, vector<8x128xf32> -> vector<8x128xf32>
    %c0_13 = arith.constant 0 : index
    %c0_14 = arith.constant 0 : index
    %16 = vector.load %arg7[%c0_13, %c0_14] : memref<1x128xf32, #tpu.memory_space<vmem>>, vector<1x128xf32>
    %17 = vector.broadcast %16 : vector<1x128xf32> to vector<8x128xf32>
    %18 = arith.addf %15, %17 : vector<8x128xf32>
    %cst_15 = arith.constant dense<0xFF800000> : vector<8xf32>
    %19 = vector.multi_reduction <maximumf>, %18, %cst_15 [1] : vector<8x128xf32> to vector<8xf32>
    %20 = vector.shape_cast %19 : vector<8xf32> to vector<8x1xf32>
    %21 = vector.broadcast %20 : vector<8x1xf32> to vector<8x128xf32>
    %22 = arith.subf %18, %21 : vector<8x128xf32>
    %23 = math.exp %22 : vector<8x128xf32>
    %cst_16 = arith.constant dense<0.000000e+00> : vector<8xf32>
    %24 = vector.multi_reduction <add>, %23, %cst_16 [1] : vector<8x128xf32> to vector<8xf32>
    %25 = vector.shape_cast %24 : vector<8xf32> to vector<8x1xf32>
    %26 = math.log %25 : vector<8x1xf32>
    %27 = arith.addf %20, %26 : vector<8x1xf32>
    %28 = vector.broadcast %27 : vector<8x1xf32> to vector<8x128xf32>
    %29 = arith.subf %18, %28 : vector<8x128xf32>
    %c0_17 = arith.constant 0 : index
    %c0_18 = arith.constant 0 : index
    %30 = vector.load %arg8[%c0_17, %c0_18] : memref<8x128xf32, #tpu.memory_space<vmem>>, vector<8x128xf32>
    tpu.vector_store %arg8[%c0_17, %c0_18], %29 {strides = array<i32>} : memref<8x128xf32, #tpu.memory_space<vmem>>, vector<8x128xf32>,
    return
  }
  func.func @transform_0(%arg0: i32) -> i32 {
    %c0_i32 = arith.constant 0 : i32
    %c0_i32_0 = arith.constant 0 : i32
    return %c0_i32 : i32
  }
  func.func @transform_1(%arg0: i32) -> (i32, i32) {
    %c0_i32 = arith.constant 0 : i32
    %c0_i32_0 = arith.constant 0 : i32
    return %arg0, %c0_i32 : i32, i32
  }
  func.func @transform_2(%arg0: i32) -> (i32, i32) {
    %c0_i32 = arith.constant 0 : i32
    %c0_i32_0 = arith.constant 0 : i32
    %c0_i32_1 = arith.constant 0 : i32
    return %c0_i32, %c0_i32_0 : i32, i32
  }
  func.func @transform_3(%arg0: i32) -> (i32, i32) {
    %c0_i32 = arith.constant 0 : i32
    %c0_i32_0 = arith.constant 0 : i32
    %c0_i32_1 = arith.constant 0 : i32
    return %c0_i32, %c0_i32_0 : i32, i32
  }
  func.func @transform_4(%arg0: i32) -> (i32, i32) {
    %c0_i32 = arith.constant 0 : i32
    %c0_i32_0 = arith.constant 0 : i32
    %c0_i32_1 = arith.constant 0 : i32
    return %c0_i32, %c0_i32_0 : i32, i32
  }
  func.func @transform_5(%arg0: i32) -> (i32, i32) {
    %c0_i32 = arith.constant 0 : i32
    %c0_i32_0 = arith.constant 0 : i32
    %c0_i32_1 = arith.constant 0 : i32
    return %c0_i32, %c0_i32_0 : i32, i32
  }
  func.func @transform_6(%arg0: i32) -> (i32, i32) {
    %c0_i32 = arith.constant 0 : i32
    %c0_i32_0 = arith.constant 0 : i32
    %c0_i32_1 = arith.constant 0 : i32
    return %c0_i32, %c0_i32_0 : i32, i32
  }
  func.func @transform_7(%arg0: i32) -> (i32, i32) {
    %c0_i32 = arith.constant 0 : i32
    %c0_i32_0 = arith.constant 0 : i32
    return %arg0, %c0_i32 : i32, i32
  }
}

</mosaic_0001>

<bundles_post_ra>
// kernel: forward.1
= control target key start
LH: loop header
LB: loop body
LE: loop exit
PB: predicated region body
PF: predicated region fallthrough
CT: control target
= control target key end

     0   :  { %13 = vsyncpa [#allocation4], 0  ;;  %s856_s0 = inlined_call_operand.<no memory space> [shape: f32[1], index: 0, kind: input, shape index: {}]   ;;  %s857_s1 = inlined_call_operand.vmem [shape: f32[8,768], index: 1, kind: input, shape index: {}]   ;;  %s858_s2 = inlined_call_operand.hbm [shape: f32[768,256], index: 2, kind: input, shape index: {}]   ;;  %s859_s3 = inlined_call_operand.hbm [shape: f32[256,128], index: 3, kind: input, shape index: {}]   ;;  %s860_s4 = inlined_call_operand.vmem [shape: f32[1,128], index: 4, kind: input, shape index: {}]   ;;  %s861_s5 = inlined_call_operand.vmem [shape: f32[128,128], index: 5, kind: input, shape index: {}]   ;;  %s862_s6 = inlined_call_operand.vmem [shape: f32[1,128], index: 6, kind: input, shape index: {}]   ;;  %s863_s7 = inlined_call_operand.vmem [shape: f32[8,128], index: 7, kind: output, shape index: {}]  }
   0x1   :  { %s23_s26 = sshll.u32 %s858_s2, 4  ;;  %s24_s26 = int_to_ptr.hbm [resolvable:$true] %s23_s26 }
   0x2   :  { %14 = vsyncpa [#allocation6], 0  ;;  %s702_s27 = smov [#allocation3]   ;;  %s36_s8 = sshll.u32 %s859_s3, 4  ;;  %s37_s8 = int_to_ptr.hbm [resolvable:$true] %s36_s8 }
   0x3   :  { %s25_s28 = sshll.u32 %s702_s27, 4  ;;  %s703_s9 = smov 256   ;;  %s26_s28 = int_to_ptr.vmem [resolvable:$true] %s25_s28 }
   0x4   :  { %s704_s10 = smov 16   ;;  %s705_s11 = smov [#allocation5]  }
   0x5   :  { %31 = dma.hbm_to_vmem [thread:$0]  %s24_s26, 24576, %s26_s28, [#allocation4], %s703_s9, %s703_s9, %s704_s10  }
   0x6   :  { %s38_s12 = sshll.u32 %s705_s11, 4  ;;  %s706_s13 = smov 128   ;;  %s39_s12 = int_to_ptr.vmem [resolvable:$true] %s38_s12 }
   0x7   :  { %s707_s14 = smov 8  }
   0x8   :  { %44 = dma.hbm_to_vmem [thread:$0]  %s37_s8, 4096, %s39_s12, [#allocation6], %s706_s13, %s706_s13, %s707_s14  }
   0x9   :  { %698 = dma.done.wait [#allocation4], 24576  }
   0xa   :  { %699 = vsyncadd [#allocation4], 4294942720 }
   0xb   :  { %700 = dma.done.wait [#allocation6], 4096  }
   0xc   :  { %701 = vsyncadd [#allocation6], 4294963200  ;;  %v159_v0 = vld [vmem:[#allocation3 + $0x2f0] sm:$0xff]  ;;  %v157_v2 = vld [vmem:[#allocation3 + $0x2e0] sm:$0xff] }
   0xd   :  { %v95_v1 = vld [vmem:[#allocation3 + $0xf0] sm:$0xff]  ;;  %299 = vmatpush.msra.mxu2 %v159_v0  ;;  %v93_v4 = vld [vmem:[#allocation3 + $0xe0] sm:$0xff]  ;;  %v96_v62 = vld [vmem:[#allocation3 + $0xf8] sm:$0xff] }
   0xe   :  { %259 = vmatpush.msra.mxu0 %v95_v1  ;;  %v191_v3 = vld [vmem:[#allocation3 + $0x3f0] sm:$0xff]  ;;  %v189_v7 = vld [vmem:[#allocation3 + $0x3e0] sm:$0xff]  ;;  %v128_v1 = vld [vmem:[#allocation3 + $0x1f8] sm:$0xff] }
   0xf   :  { %v127_v5 = vld [vmem:[#allocation3 + $0x1f0] sm:$0xff]  ;;  %319 = vmatpush.msra.mxu3 %v191_v3  ;;  %300 = vmatpush.msra.mxu2 %v157_v2  ;;  %v125_v9 = vld [vmem:[#allocation3 + $0x1e0] sm:$0xff]  ;;  %v94_v2 = vld [vmem:[#allocation3 + $0xe8] sm:$0xff] }
  0x10   :  { %279 = vmatpush.msra.mxu1 %v127_v5  ;;  %v155_v6 = vld [vmem:[#allocation3 + $0x2d0] sm:$0xff]  ;;  %260 = vmatpush.msra.mxu0 %v93_v4  ;;  %v153_v11 = vld [vmem:[#allocation3 + $0x2c0] sm:$0xff] }
  0x11   :  { %v91_v8 = vld [vmem:[#allocation3 + $0xd0] sm:$0xff]  ;;  %320 = vmatpush.msra.mxu3 %v189_v7  ;;  %v89_v12 = vld [vmem:[#allocation3 + $0xc0] sm:$0xff]  ;;  %301 = vmatpush.msra.mxu2 %v155_v6  ;;  %v92_v6 = vld [vmem:[#allocation3 + $0xd8] sm:$0xff] }
  0x12   :  { %v187_v10 = vld [vmem:[#allocation3 + $0x3d0] sm:$0xff]  ;;  %280 = vmatpush.msra.mxu1 %v125_v9  ;;  %261 = vmatpush.msra.mxu0 %v91_v8  ;;  %v185_v14 = vld [vmem:[#allocation3 + $0x3c0] sm:$0xff]  ;;  %v126_v7 = vld [vmem:[#allocation3 + $0x1e8] sm:$0xff] }
  0x13   :  { %v123_v13 = vld [vmem:[#allocation3 + $0x1d0] sm:$0xff]  ;;  %v121_v15 = vld [vmem:[#allocation3 + $0x1c0] sm:$0xff]  ;;  %321 = vmatpush.msra.mxu3 %v187_v10  ;;  %302 = vmatpush.msra.mxu2 %v153_v11  ;;  %v90_v10 = vld [vmem:[#allocation3 + $0xc8] sm:$0xff] }
  0x14   :  { %281 = vmatpush.msra.mxu1 %v123_v13  ;;  %v151_v16 = vld [vmem:[#allocation3 + $0x2b0] sm:$0xff]  ;;  %262 = vmatpush.msra.mxu0 %v89_v12  ;;  %v149_v20 = vld [vmem:[#allocation3 + $0x2a0] sm:$0xff]  ;;  %v124_v11 = vld [vmem:[#allocation3 + $0x1d8] sm:$0xff] }
  0x15   :  { %v87_v17 = vld [vmem:[#allocation3 + $0xb0] sm:$0xff]  ;;  %322 = vmatpush.msra.mxu3 %v185_v14  ;;  %v85_v21 = vld [vmem:[#allocation3 + $0xa0] sm:$0xff]  ;;  %303 = vmatpush.msra.mxu2 %v151_v16  ;;  %v88_v14 = vld [vmem:[#allocation3 + $0xb8] sm:$0xff] }
  0x16   :  { %v183_v18 = vld [vmem:[#allocation3 + $0x3b0] sm:$0xff]  ;;  %282 = vmatpush.msra.mxu1 %v121_v15  ;;  %263 = vmatpush.msra.mxu0 %v87_v17  ;;  %v181_v22 = vld [vmem:[#allocation3 + $0x3a0] sm:$0xff]  ;;  %v122_v15 = vld [vmem:[#allocation3 + $0x1c8] sm:$0xff] }
  0x17   :  { %v119_v19 = vld [vmem:[#allocation3 + $0x1b0] sm:$0xff]  ;;  %v117_v23 = vld [vmem:[#allocation3 + $0x1a0] sm:$0xff]  ;;  %323 = vmatpush.msra.mxu3 %v183_v18  ;;  %304 = vmatpush.msra.mxu2 %v149_v20  ;;  %v86_v18 = vld [vmem:[#allocation3 + $0xa8] sm:$0xff] }
  0x18   :  { %283 = vmatpush.msra.mxu1 %v119_v19  ;;  %v147_v24 = vld [vmem:[#allocation3 + $0x290] sm:$0xff]  ;;  %264 = vmatpush.msra.mxu0 %v85_v21  ;;  %v145_v28 = vld [vmem:[#allocation3 + $0x280] sm:$0xff]  ;;  %v120_v19 = vld [vmem:[#allocation3 + $0x1b8] sm:$0xff] }
  0x19   :  { %v83_v25 = vld [vmem:[#allocation3 + $0x90] sm:$0xff]  ;;  %324 = vmatpush.msra.mxu3 %v181_v22  ;;  %v81_v29 = vld [vmem:[#allocation3 + $0x80] sm:$0xff]  ;;  %305 = vmatpush.msra.mxu2 %v147_v24  ;;  %v84_v22 = vld [vmem:[#allocation3 + $0x98] sm:$0xff] }
  0x1a   :  { %v179_v26 = vld [vmem:[#allocation3 + $0x390] sm:$0xff]  ;;  %284 = vmatpush.msra.mxu1 %v117_v23  ;;  %265 = vmatpush.msra.mxu0 %v83_v25  ;;  %v177_v30 = vld [vmem:[#allocation3 + $0x380] sm:$0xff]  ;;  %v118_v23 = vld [vmem:[#allocation3 + $0x1a8] sm:$0xff] }
  0x1b   :  { %v115_v27 = vld [vmem:[#allocation3 + $0x190] sm:$0xff]  ;;  %v113_v31 = vld [vmem:[#allocation3 + $0x180] sm:$0xff]  ;;  %325 = vmatpush.msra.mxu3 %v179_v26  ;;  %306 = vmatpush.msra.mxu2 %v145_v28  ;;  %v82_v26 = vld [vmem:[#allocation3 + $0x88] sm:$0xff] }
  0x1c   :  { %285 = vmatpush.msra.mxu1 %v115_v27  ;;  %v143_v32 = vld [vmem:[#allocation3 + $0x270] sm:$0xff]  ;;  %266 = vmatpush.msra.mxu0 %v81_v29  ;;  %v141_v36 = vld [vmem:[#allocation3 + $0x260] sm:$0xff]  ;;  %v116_v27 = vld [vmem:[#allocation3 + $0x198] sm:$0xff] }
  0x1d   :  { %v79_v33 = vld [vmem:[#allocation3 + $0x70] sm:$0xff]  ;;  %326 = vmatpush.msra.mxu3 %v177_v30  ;;  %v77_v37 = vld [vmem:[#allocation3 + $0x60] sm:$0xff]  ;;  %307 = vmatpush.msra.mxu2 %v143_v32  ;;  %v80_v30 = vld [vmem:[#allocation3 + $0x78] sm:$0xff] }
  0x1e   :  { %v175_v34 = vld [vmem:[#allocation3 + $0x370] sm:$0xff]  ;;  %286 = vmatpush.msra.mxu1 %v113_v31  ;;  %267 = vmatpush.msra.mxu0 %v79_v33  ;;  %v173_v38 = vld [vmem:[#allocation3 + $0x360] sm:$0xff]  ;;  %v114_v31 = vld [vmem:[#allocation3 + $0x188] sm:$0xff] }
  0x1f   :  { %v111_v35 = vld [vmem:[#allocation3 + $0x170] sm:$0xff]  ;;  %v109_v39 = vld [vmem:[#allocation3 + $0x160] sm:$0xff]  ;;  %327 = vmatpush.msra.mxu3 %v175_v34  ;;  %308 = vmatpush.msra.mxu2 %v141_v36  ;;  %v78_v34 = vld [vmem:[#allocation3 + $0x68] sm:$0xff] }
  0x20   :  { %287 = vmatpush.msra.mxu1 %v111_v35  ;;  %v139_v40 = vld [vmem:[#allocation3 + $0x250] sm:$0xff]  ;;  %268 = vmatpush.msra.mxu0 %v77_v37  ;;  %v137_v44 = vld [vmem:[#allocation3 + $0x240] sm:$0xff]  ;;  %v112_v35 = vld [vmem:[#allocation3 + $0x178] sm:$0xff] }
  0x21   :  { %v75_v41 = vld [vmem:[#allocation3 + $0x50] sm:$0xff]  ;;  %328 = vmatpush.msra.mxu3 %v173_v38  ;;  %v73_v45 = vld [vmem:[#allocation3 + $0x40] sm:$0xff]  ;;  %309 = vmatpush.msra.mxu2 %v139_v40  ;;  %v76_v38 = vld [vmem:[#allocation3 + $0x58] sm:$0xff] }
  0x22   :  { %v171_v42 = vld [vmem:[#allocation3 + $0x350] sm:$0xff]  ;;  %288 = vmatpush.msra.mxu1 %v109_v39  ;;  %269 = vmatpush.msra.mxu0 %v75_v41  ;;  %v169_v46 = vld [vmem:[#allocation3 + $0x340] sm:$0xff]  ;;  %v110_v39 = vld [vmem:[#allocation3 + $0x168] sm:$0xff] }
  0x23   :  { %v107_v43 = vld [vmem:[#allocation3 + $0x150] sm:$0xff]  ;;  %v105_v47 = vld [vmem:[#allocation3 + $0x140] sm:$0xff]  ;;  %329 = vmatpush.msra.mxu3 %v171_v42  ;;  %310 = vmatpush.msra.mxu2 %v137_v44  ;;  %v74_v42 = vld [vmem:[#allocation3 + $0x48] sm:$0xff] }
  0x24   :  { %289 = vmatpush.msra.mxu1 %v107_v43  ;;  %v135_v48 = vld [vmem:[#allocation3 + $0x230] sm:$0xff]  ;;  %270 = vmatpush.msra.mxu0 %v73_v45  ;;  %v133_v52 = vld [vmem:[#allocation3 + $0x220] sm:$0xff]  ;;  %v108_v43 = vld [vmem:[#allocation3 + $0x158] sm:$0xff] }
  0x25   :  { %v71_v49 = vld [vmem:[#allocation3 + $0x30] sm:$0xff]  ;;  %330 = vmatpush.msra.mxu3 %v169_v46  ;;  %v69_v53 = vld [vmem:[#allocation3 + $0x20] sm:$0xff]  ;;  %311 = vmatpush.msra.mxu2 %v135_v48  ;;  %v72_v46 = vld [vmem:[#allocation3 + $0x38] sm:$0xff] }
  0x26   :  { %v167_v50 = vld [vmem:[#allocation3 + $0x330] sm:$0xff]  ;;  %290 = vmatpush.msra.mxu1 %v105_v47  ;;  %271 = vmatpush.msra.mxu0 %v71_v49  ;;  %v165_v54 = vld [vmem:[#allocation3 + $0x320] sm:$0xff]  ;;  %v106_v47 = vld [vmem:[#allocation3 + $0x148] sm:$0xff] }
  0x27   :  { %v103_v51 = vld [vmem:[#allocation3 + $0x130] sm:$0xff]  ;;  %v101_v55 = vld [vmem:[#allocation3 + $0x120] sm:$0xff]  ;;  %331 = vmatpush.msra.mxu3 %v167_v50  ;;  %312 = vmatpush.msra.mxu2 %v133_v52  ;;  %v70_v50 = vld [vmem:[#allocation3 + $0x28] sm:$0xff] }
  0x28   :  { %291 = vmatpush.msra.mxu1 %v103_v51  ;;  %v131_v56 = vld [vmem:[#allocation3 + $0x210] sm:$0xff]  ;;  %272 = vmatpush.msra.mxu0 %v69_v53  ;;  %v129_v60 = vld [vmem:[#allocation3 + $0x200] sm:$0xff]  ;;  %v104_v51 = vld [vmem:[#allocation3 + $0x138] sm:$0xff] }
  0x29   :  { %v67_v57 = vld [vmem:[#allocation3 + $0x10] sm:$0xff]  ;;  %332 = vmatpush.msra.mxu3 %v165_v54  ;;  %v65_v61 = vld [vmem:[#allocation3] sm:$0xff]  ;;  %313 = vmatpush.msra.mxu2 %v131_v56  ;;  %v68_v54 = vld [vmem:[#allocation3 + $0x18] sm:$0xff] }
  0x2a   :  { %v163_v58 = vld [vmem:[#allocation3 + $0x310] sm:$0xff]  ;;  %292 = vmatpush.msra.mxu1 %v101_v55  ;;  %273 = vmatpush.msra.mxu0 %v67_v57  ;;  %v161_v63 = vld [vmem:[#allocation3 + $0x300] sm:$0xff]  ;;  %v102_v55 = vld [vmem:[#allocation3 + $0x128] sm:$0xff] }
  0x2b   :  { %v99_v59 = vld [vmem:[#allocation3 + $0x110] sm:$0xff]  ;;  %333 = vmatpush.msra.mxu3 %v163_v58  ;;  %314 = vmatpush.msra.mxu2 %v129_v60  ;;  %v97_v3 = vld [vmem:[#allocation3 + $0x100] sm:$0xff]  ;;  %v66_v58 = vld [vmem:[#allocation3 + $0x8] sm:$0xff] }
  0x2c   :  { %293 = vmatpush.msra.mxu1 %v99_v59  ;;  %v223_v0 = vld [vmem:[#allocation3 + $0x4f0] sm:$0xff]  ;;  %274 = vmatpush.msra.mxu0 %v65_v61  ;;  %v221_v4 = vld [vmem:[#allocation3 + $0x4e0] sm:$0xff]  ;;  %v100_v59 = vld [vmem:[#allocation3 + $0x118] sm:$0xff] }
  0x2d   :  { %379 = vmatpush.msrb.mxu2 %v96_v62  ;;  %334 = vmatpush.msra.mxu3 %v161_v63  ;;  %v255_v5 = vld [vmem:[#allocation3 + $0x5f0] sm:$0xff]  ;;  %v253_v9 = vld [vmem:[#allocation3 + $0x5e0] sm:$0xff]  ;;  %v224_v62 = vld [vmem:[#allocation3 + $0x4f8] sm:$0xff] }
  0x2e   :  { %339 = vmatpush.msrb.mxu0 %v223_v0  ;;  %294 = vmatpush.msra.mxu1 %v97_v3  ;;  %v219_v8 = vld [vmem:[#allocation3 + $0x4d0] sm:$0xff]  ;;  %v217_v12 = vld [vmem:[#allocation3 + $0x4c0] sm:$0xff]  ;;  %v98_v0 = vld [vmem:[#allocation3 + $0x108] sm:$0xff] }
  0x2f   :  { %399 = vmatpush.msrb.mxu3 %v128_v1  ;;  %380 = vmatpush.msrb.mxu2 %v94_v2  ;;  %v251_v13 = vld [vmem:[#allocation3 + $0x5d0] sm:$0xff]  ;;  %v249_v17 = vld [vmem:[#allocation3 + $0x5c0] sm:$0xff]  ;;  %v768_v2 = vld [vmem:[%s857_s1 + $0x18] sm:$0xff] }
  0x30   :  { %340 = vmatpush.msrb.mxu0 %v221_v4  ;;  %359 = vmatpush.msrb.mxu1 %v255_v5  ;;  %v215_v16 = vld [vmem:[#allocation3 + $0x4b0] sm:$0xff]  ;;  %v213_v20 = vld [vmem:[#allocation3 + $0x4a0] sm:$0xff]  ;;  %v160_v3 = vld [vmem:[#allocation3 + $0x2f8] sm:$0xff] }
  0x31   :  { %381 = vmatpush.msrb.mxu2 %v92_v6  ;;  %400 = vmatpush.msrb.mxu3 %v126_v7  ;;  %v247_v21 = vld [vmem:[#allocation3 + $0x5b0] sm:$0xff]  ;;  %v245_v25 = vld [vmem:[#allocation3 + $0x5a0] sm:$0xff]  ;;  %v222_v4 = vld [vmem:[#allocation3 + $0x4e8] sm:$0xff] }
  0x32   :  { %341 = vmatpush.msrb.mxu0 %v219_v8  ;;  %360 = vmatpush.msrb.mxu1 %v253_v9  ;;  %v211_v24 = vld [vmem:[#allocation3 + $0x490] sm:$0xff]  ;;  %v209_v28 = vld [vmem:[#allocation3 + $0x480] sm:$0xff]  ;;  %v256_v5 = vld [vmem:[#allocation3 + $0x5f8] sm:$0xff] }
  0x33   :  { %382 = vmatpush.msrb.mxu2 %v90_v10  ;;  %401 = vmatpush.msrb.mxu3 %v124_v11  ;;  %v243_v29 = vld [vmem:[#allocation3 + $0x590] sm:$0xff]  ;;  %v241_v33 = vld [vmem:[#allocation3 + $0x580] sm:$0xff]  ;;  %v158_v7 = vld [vmem:[#allocation3 + $0x2e8] sm:$0xff] }
  0x34   :  { %342 = vmatpush.msrb.mxu0 %v217_v12  ;;  %361 = vmatpush.msrb.mxu1 %v251_v13  ;;  %v207_v32 = vld [vmem:[#allocation3 + $0x470] sm:$0xff]  ;;  %v205_v36 = vld [vmem:[#allocation3 + $0x460] sm:$0xff]  ;;  %v775_v8 = vld [vmem:[%s857_s1 + $0x8] sm:$0xff] }
  0x35   :  { %383 = vmatpush.msrb.mxu2 %v88_v14  ;;  %402 = vmatpush.msrb.mxu3 %v122_v15  ;;  %v239_v37 = vld [vmem:[#allocation3 + $0x570] sm:$0xff]  ;;  %v237_v41 = vld [vmem:[#allocation3 + $0x560] sm:$0xff]  ;;  %v220_v9 = vld [vmem:[#allocation3 + $0x4d8] sm:$0xff] }
  0x36   :  { %343 = vmatpush.msrb.mxu0 %v215_v16  ;;  %362 = vmatpush.msrb.mxu1 %v249_v17  ;;  %v203_v40 = vld [vmem:[#allocation3 + $0x450] sm:$0xff]  ;;  %v201_v44 = vld [vmem:[#allocation3 + $0x440] sm:$0xff]  ;;  %v192_v10 = vld [vmem:[#allocation3 + $0x3f8] sm:$0xff] }
  0x37   :  { %384 = vmatpush.msrb.mxu2 %v86_v18  ;;  %403 = vmatpush.msrb.mxu3 %v120_v19  ;;  %v235_v45 = vld [vmem:[#allocation3 + $0x550] sm:$0xff]  ;;  %v233_v49 = vld [vmem:[#allocation3 + $0x540] sm:$0xff]  ;;  %v254_v11 = vld [vmem:[#allocation3 + $0x5e8] sm:$0xff] }
  0x38   :  { %344 = vmatpush.msrb.mxu0 %v213_v20  ;;  %363 = vmatpush.msrb.mxu1 %v247_v21  ;;  %v199_v48 = vld [vmem:[#allocation3 + $0x430] sm:$0xff]  ;;  %v197_v52 = vld [vmem:[#allocation3 + $0x420] sm:$0xff]  ;;  %v156_v12 = vld [vmem:[#allocation3 + $0x2d8] sm:$0xff] }
  0x39   :  { %385 = vmatpush.msrb.mxu2 %v84_v22  ;;  %404 = vmatpush.msrb.mxu3 %v118_v23  ;;  %v231_v53 = vld [vmem:[#allocation3 + $0x530] sm:$0xff]  ;;  %v229_v57 = vld [vmem:[#allocation3 + $0x520] sm:$0xff]  ;;  %v218_v13 = vld [vmem:[#allocation3 + $0x4c8] sm:$0xff] }
  0x3a   :  { %345 = vmatpush.msrb.mxu0 %v211_v24  ;;  %364 = vmatpush.msrb.mxu1 %v245_v25  ;;  %v195_v56 = vld [vmem:[#allocation3 + $0x410] sm:$0xff]  ;;  %v193_v61 = vld [vmem:[#allocation3 + $0x400] sm:$0xff]  ;;  %v190_v14 = vld [vmem:[#allocation3 + $0x3e8] sm:$0xff] }
  0x3b   :  { %386 = vmatpush.msrb.mxu2 %v82_v26  ;;  %405 = vmatpush.msrb.mxu3 %v116_v27  ;;  %v757_v60 = vld [vmem:[%s857_s1 + $0x10] sm:$0xff]  ;;  %v762_v1 = vld [vmem:[%s857_s1] sm:$0xff]  ;;  %v252_v15 = vld [vmem:[#allocation3 + $0x5d8] sm:$0xff] }
  0x3c   :  { %346 = vmatpush.msrb.mxu0 %v209_v28  ;;  %365 = vmatpush.msrb.mxu1 %v243_v29  ;;  %v227_v63 = vld [vmem:[#allocation3 + $0x510] sm:$0xff]  ;;  %v225_v6 = vld [vmem:[#allocation3 + $0x500] sm:$0xff]  ;;  %v154_v16 = vld [vmem:[#allocation3 + $0x2c8] sm:$0xff] }
  0x3d   :  { %387 = vmatpush.msrb.mxu2 %v80_v30  ;;  %406 = vmatpush.msrb.mxu3 %v114_v31  ;;  %v216_v17 = vld [vmem:[#allocation3 + $0x4b8] sm:$0xff]  ;;  %v250_v19 = vld [vmem:[#allocation3 + $0x5c8] sm:$0xff]  ;;  %v781_v20 = vld [vmem:[%s857_s1 + $0x20] sm:$0xff] }
  0x3e   :  { %347 = vmatpush.msrb.mxu0 %v207_v32  ;;  %366 = vmatpush.msrb.mxu1 %v241_v33  ;;  %v188_v18 = vld [vmem:[#allocation3 + $0x3d8] sm:$0xff]  ;;  %v214_v21 = vld [vmem:[#allocation3 + $0x4a8] sm:$0xff] }
  0x3f   :  { %388 = vmatpush.msrb.mxu2 %v78_v34  ;;  %407 = vmatpush.msrb.mxu3 %v112_v35  ;;  %v152_v22 = vld [vmem:[#allocation3 + $0x2b8] sm:$0xff]  ;;  %v186_v23 = vld [vmem:[#allocation3 + $0x3c8] sm:$0xff] }
  0x40   :  { %348 = vmatpush.msrb.mxu0 %v205_v36  ;;  %367 = vmatpush.msrb.mxu1 %v239_v37  ;;  %v248_v24 = vld [vmem:[#allocation3 + $0x5b8] sm:$0xff]  ;;  %v786_v25 = vld [vmem:[%s857_s1 + $0x28] sm:$0xff] }
  0x41   :  { %389 = vmatpush.msrb.mxu2 %v76_v38  ;;  %408 = vmatpush.msrb.mxu3 %v110_v39  ;;  %v150_v26 = vld [vmem:[#allocation3 + $0x2a8] sm:$0xff]  ;;  %v184_v27 = vld [vmem:[#allocation3 + $0x3b8] sm:$0xff] }
  0x42   :  { %349 = vmatpush.msrb.mxu0 %v203_v40  ;;  %368 = vmatpush.msrb.mxu1 %v237_v41  ;;  %v212_v28 = vld [vmem:[#allocation3 + $0x498] sm:$0xff]  ;;  %v246_v29 = vld [vmem:[#allocation3 + $0x5a8] sm:$0xff] }
  0x43   :  { %390 = vmatpush.msrb.mxu2 %v74_v42  ;;  %409 = vmatpush.msrb.mxu3 %v108_v43  ;;  %v148_v30 = vld [vmem:[#allocation3 + $0x298] sm:$0xff]  ;;  %v182_v31 = vld [vmem:[#allocation3 + $0x3a8] sm:$0xff] }
  0x44   :  { %350 = vmatpush.msrb.mxu0 %v201_v44  ;;  %369 = vmatpush.msrb.mxu1 %v235_v45  ;;  %v210_v32 = vld [vmem:[#allocation3 + $0x488] sm:$0xff]  ;;  %v244_v33 = vld [vmem:[#allocation3 + $0x598] sm:$0xff] }
  0x45   :  { %391 = vmatpush.msrb.mxu2 %v72_v46  ;;  %410 = vmatpush.msrb.mxu3 %v106_v47  ;;  %v146_v34 = vld [vmem:[#allocation3 + $0x288] sm:$0xff]  ;;  %v180_v35 = vld [vmem:[#allocation3 + $0x398] sm:$0xff] }
  0x46   :  { %351 = vmatpush.msrb.mxu0 %v199_v48  ;;  %370 = vmatpush.msrb.mxu1 %v233_v49  ;;  %v208_v36 = vld [vmem:[#allocation3 + $0x478] sm:$0xff]  ;;  %v242_v37 = vld [vmem:[#allocation3 + $0x588] sm:$0xff] }
  0x47   :  { %392 = vmatpush.msrb.mxu2 %v70_v50  ;;  %411 = vmatpush.msrb.mxu3 %v104_v51  ;;  %v144_v38 = vld [vmem:[#allocation3 + $0x278] sm:$0xff]  ;;  %v178_v39 = vld [vmem:[#allocation3 + $0x388] sm:$0xff] }
  0x48   :  { %352 = vmatpush.msrb.mxu0 %v197_v52  ;;  %371 = vmatpush.msrb.mxu1 %v231_v53  ;;  %v206_v40 = vld [vmem:[#allocation3 + $0x468] sm:$0xff]  ;;  %v240_v41 = vld [vmem:[#allocation3 + $0x578] sm:$0xff] }
  0x49   :  { %393 = vmatpush.msrb.mxu2 %v68_v54  ;;  %412 = vmatpush.msrb.mxu3 %v102_v55  ;;  %v142_v42 = vld [vmem:[#allocation3 + $0x268] sm:$0xff]  ;;  %v176_v43 = vld [vmem:[#allocation3 + $0x378] sm:$0xff] }
  0x4a   :  { %353 = vmatpush.msrb.mxu0 %v195_v56  ;;  %372 = vmatpush.msrb.mxu1 %v229_v57  ;;  %v204_v44 = vld [vmem:[#allocation3 + $0x458] sm:$0xff]  ;;  %v238_v45 = vld [vmem:[#allocation3 + $0x568] sm:$0xff] }
  0x4b   :  { %394 = vmatpush.msrb.mxu2 %v66_v58  ;;  %413 = vmatpush.msrb.mxu3 %v100_v59  ;;  %v140_v46 = vld [vmem:[#allocation3 + $0x258] sm:$0xff]  ;;  %v174_v47 = vld [vmem:[#allocation3 + $0x368] sm:$0xff] }
  0x4c   :  { %315 = vmatmul.f32.vlgmr.msra.gmra.mxu2 %v757_v60  ;;  %354 = vmatpush.msrb.mxu0 %v193_v61  ;;  %v202_v48 = vld [vmem:[#allocation3 + $0x448] sm:$0xff]  ;;  %v236_v49 = vld [vmem:[#allocation3 + $0x558] sm:$0xff] }
  0x4d   :  { %459 = vmatpush.msra.mxu2 %v224_v62  ;;  %373 = vmatpush.msrb.mxu1 %v227_v63  ;;  %v138_v50 = vld [vmem:[#allocation3 + $0x248] sm:$0xff]  ;;  %v172_v51 = vld [vmem:[#allocation3 + $0x358] sm:$0xff] }
  0x4e   :  { %414 = vmatpush.msrb.mxu3 %v98_v0  ;;  %275 = vmatmul.f32.vlgmr.msra.gmra.mxu0 %v762_v1  ;;  %v200_v52 = vld [vmem:[#allocation3 + $0x438] sm:$0xff]  ;;  %v234_v53 = vld [vmem:[#allocation3 + $0x548] sm:$0xff] }
  0x4f   :  { %335 = vmatmul.f32.vlgmr.msra.gmra.mxu3 %v768_v2  ;;  %419 = vmatpush.msra.mxu0 %v160_v3  ;;  %v136_v54 = vld [vmem:[#allocation3 + $0x238] sm:$0xff]  ;;  %v170_v55 = vld [vmem:[#allocation3 + $0x348] sm:$0xff] }
  0x50   :  { %460 = vmatpush.msra.mxu2 %v222_v4  ;;  %479 = vmatpush.msra.mxu3 %v256_v5  ;;  %v198_v56 = vld [vmem:[#allocation3 + $0x428] sm:$0xff]  ;;  %v232_v57 = vld [vmem:[#allocation3 + $0x538] sm:$0xff] }
  0x51   :  { %374 = vmatpush.msrb.mxu1 %v225_v6  ;;  %420 = vmatpush.msra.mxu0 %v158_v7  ;;  %v134_v58 = vld [vmem:[#allocation3 + $0x228] sm:$0xff]  ;;  %v168_v59 = vld [vmem:[#allocation3 + $0x338] sm:$0xff] }
  0x52   :  { %295 = vmatmul.f32.vlgmr.msra.gmra.mxu1 %v775_v8  ;;  %461 = vmatpush.msra.mxu2 %v220_v9  ;;  %v196_v61 = vld [vmem:[#allocation3 + $0x418] sm:$0xff]  ;;  %v230_v62 = vld [vmem:[#allocation3 + $0x528] sm:$0xff]  ;;  %v515_v9 = vld [vmem:[#allocation5 + $0x70] sm:$0xff] }
  0x53   :  { %439 = vmatpush.msra.mxu1 %v192_v10  ;;  %480 = vmatpush.msra.mxu3 %v254_v11  ;;  %v132_v63 = vld [vmem:[#allocation3 + $0x218] sm:$0xff]  ;;  %v166_v0 = vld [vmem:[#allocation3 + $0x328] sm:$0xff]  ;;  %v513_v11 = vld [vmem:[#allocation5 + $0x60] sm:$0xff] }
  0x54   :  { %421 = vmatpush.msra.mxu0 %v156_v12  ;;  %462 = vmatpush.msra.mxu2 %v218_v13  ;;  %v228_v3 = vld [vmem:[#allocation3 + $0x518] sm:$0xff]  ;;  %v130_v4 = vld [vmem:[#allocation3 + $0x208] sm:$0xff]  ;;  %v511_v13 = vld [vmem:[#allocation5 + $0x50] sm:$0xff] }
  0x55   :  { %440 = vmatpush.msra.mxu1 %v190_v14  ;;  %481 = vmatpush.msra.mxu3 %v252_v15  ;;  %v164_v5 = vld [vmem:[#allocation3 + $0x318] sm:$0xff]  ;;  %v226_v6 = vld [vmem:[#allocation3 + $0x508] sm:$0xff]  ;;  %v509_v15 = vld [vmem:[#allocation5 + $0x40] sm:$0xff] }
  0x56   :  { %422 = vmatpush.msra.mxu0 %v154_v16  ;;  %463 = vmatpush.msra.mxu2 %v216_v17  ;;  %v162_v7 = vld [vmem:[#allocation3 + $0x308] sm:$0xff]  ;;  %v512_v12 = vld [vmem:[#allocation5 + $0x58] sm:$0xff]  ;;  %v507_v16 = vld [vmem:[#allocation5 + $0x30] sm:$0xff] }
  0x57   :  { %441 = vmatpush.msra.mxu1 %v188_v18  ;;  %482 = vmatpush.msra.mxu3 %v250_v19  ;;  %v514_v10 = vld [vmem:[#allocation5 + $0x68] sm:$0xff]  ;;  %v504_v18 = vld [vmem:[#allocation5 + $0x18] sm:$0xff]  ;;  %v503_v19 = vld [vmem:[#allocation5 + $0x10] sm:$0xff] }
  0x58   :  { %355 = vmatmul.f32.vlgmr.msrb.gmra.mxu0 %v781_v20  ;;  %464 = vmatpush.msra.mxu2 %v214_v21  ;;  %v510_v14 = vld [vmem:[#allocation5 + $0x48] sm:$0xff] }
  0x59   :  { %423 = vmatpush.msra.mxu0 %v152_v22  ;;  %442 = vmatpush.msra.mxu1 %v186_v23  ;;  %v506_v17 = vld [vmem:[#allocation5 + $0x28] sm:$0xff]  ;;  %v531_v22 = vld [vmem:[#allocation5 + $0xf0] sm:$0xff]  ;;  %v501_v23 = vld [vmem:[#allocation5] sm:$0xff] }
  0x5a   :  { %483 = vmatpush.msra.mxu3 %v248_v24  ;;  %375 = vmatmul.f32.vlgmr.msrb.gmra.mxu1 %v786_v25  ;;  %v502_v21 = vld [vmem:[#allocation5 + $0x8] sm:$0xff] }
  0x5b   :  { %424 = vmatpush.msra.mxu0 %v150_v26  ;;  %443 = vmatpush.msra.mxu1 %v184_v27  ;;  %v530_v24 = vld [vmem:[#allocation5 + $0xe8] sm:$0xff]  ;;  %v528_v26 = vld [vmem:[#allocation5 + $0xd8] sm:$0xff]  ;;  %v527_v27 = vld [vmem:[#allocation5 + $0xd0] sm:$0xff] }
  0x5c   :  { %465 = vmatpush.msra.mxu2 %v212_v28  ;;  %484 = vmatpush.msra.mxu3 %v246_v29  ;;  %v526_v28 = vld [vmem:[#allocation5 + $0xc8] sm:$0xff]  ;;  %v525_v29 = vld [vmem:[#allocation5 + $0xc0] sm:$0xff] }
  0x5d   :  { %425 = vmatpush.msra.mxu0 %v148_v30  ;;  %444 = vmatpush.msra.mxu1 %v182_v31  ;;  %v258_v30 = vstv %s856_s0  ;;  %v524_v31 = vld [vmem:[#allocation5 + $0xb8] sm:$0xff] }
  0x5e   :  { %466 = vmatpush.msra.mxu2 %v210_v32  ;;  %485 = vmatpush.msra.mxu3 %v244_v33 }
  0x5f   :  { %426 = vmatpush.msra.mxu0 %v146_v34  ;;  %445 = vmatpush.msra.mxu1 %v180_v35  ;;  %v523_v34 = vld [vmem:[#allocation5 + $0xb0] sm:$0xff]  ;;  %v522_v35 = vld [vmem:[#allocation5 + $0xa8] sm:$0xff] }
  0x60   :  { %467 = vmatpush.msra.mxu2 %v208_v36  ;;  %486 = vmatpush.msra.mxu3 %v242_v37 }
  0x61   :  { %427 = vmatpush.msra.mxu0 %v144_v38  ;;  %446 = vmatpush.msra.mxu1 %v178_v39  ;;  %v521_v39 = vld [vmem:[#allocation5 + $0xa0] sm:$0xff] }
  0x62   :  { %468 = vmatpush.msra.mxu2 %v206_v40  ;;  %487 = vmatpush.msra.mxu3 %v240_v41 }
  0x63   :  { %428 = vmatpush.msra.mxu0 %v142_v42  ;;  %447 = vmatpush.msra.mxu1 %v176_v43  ;;  %v520_v42 = vld [vmem:[#allocation5 + $0x98] sm:$0xff] }
  0x64   :  { %469 = vmatpush.msra.mxu2 %v204_v44  ;;  %488 = vmatpush.msra.mxu3 %v238_v45  ;;  %v519_v44 = vld [vmem:[#allocation5 + $0x90] sm:$0xff] }
  0x65   :  { %429 = vmatpush.msra.mxu0 %v140_v46  ;;  %448 = vmatpush.msra.mxu1 %v174_v47  ;;  %v518_v47 = vld [vmem:[#allocation5 + $0x88] sm:$0xff] }
  0x66   :  { %470 = vmatpush.msra.mxu2 %v202_v48  ;;  %489 = vmatpush.msra.mxu3 %v236_v49 }
  0x67   :  { %395 = vmatmul.f32.vlgmr.msrb.gmra.mxu2 %v762_v1  ;;  %430 = vmatpush.msra.mxu0 %v138_v50  ;;  %v194_v1 = vld [vmem:[#allocation3 + $0x408] sm:$0xff]  ;;  %v517_v50 = vld [vmem:[#allocation5 + $0x80] sm:$0xff] }
  0x68   :  { %449 = vmatpush.msra.mxu1 %v172_v51  ;;  %471 = vmatpush.msra.mxu2 %v200_v52 }
  0x69   :  { %490 = vmatpush.msra.mxu3 %v234_v53  ;;  %431 = vmatpush.msra.mxu0 %v136_v54 }
  0x6a   :  { %415 = vmatmul.f32.vlgmr.msrb.gmra.mxu3 %v775_v8  ;;  %450 = vmatpush.msra.mxu1 %v170_v55  ;;  %v516_v8 = vld [vmem:[#allocation5 + $0x78] sm:$0xff] }
  0x6b   :  { %472 = vmatpush.msra.mxu2 %v198_v56  ;;  %491 = vmatpush.msra.mxu3 %v232_v57 }
  0x6c   :  { %432 = vmatpush.msra.mxu0 %v134_v58  ;;  %451 = vmatpush.msra.mxu1 %v168_v59 }
  0x6d   :  { %473 = vmatpush.msra.mxu2 %v196_v61  ;;  %492 = vmatpush.msra.mxu3 %v230_v62 }
  0x6e   :  { %433 = vmatpush.msra.mxu0 %v132_v63  ;;  %452 = vmatpush.msra.mxu1 %v166_v0 }
  0x6f   :  { %474 = vmatpush.msra.mxu2 %v194_v1  ;;  %493 = vmatpush.msra.mxu3 %v228_v3  ;;  %v593_v3 = vld [vmem:[%s861_s5 + $0x78] sm:$0xff] }
  0x70   :  { %475 = vmatmul.f32.vlgmr.msra.gmra.mxu2 %v781_v20  ;;  %434 = vmatpush.msra.mxu0 %v130_v4  ;;  %v532_v20 = vld [vmem:[#allocation5 + $0xf8] sm:$0xff]  ;;  %v592_v4 = vld [vmem:[%s861_s5 + $0x70] sm:$0xff] }
  0x71   :  { %453 = vmatpush.msra.mxu1 %v164_v5  ;;  %494 = vmatpush.msra.mxu3 %v226_v6  ;;  %v591_v5 = vld [vmem:[%s861_s5 + $0x68] sm:$0xff]  ;;  %v590_v6 = vld [vmem:[%s861_s5 + $0x60] sm:$0xff] }
  0x72   :  { %435 = vmatmul.f32.vlgmr.msra.gmra.mxu0 %v757_v60  ;;  %495 = vmatmul.f32.vlgmr.msra.gmra.mxu3 %v786_v25  ;;  %v508_v60 = vld [vmem:[#allocation5 + $0x38] sm:$0xff]  ;;  %v529_v25 = vld [vmem:[#allocation5 + $0xe0] sm:$0xff] }
  0x73   :  { %454 = vmatpush.msra.mxu1 %v162_v7  ;;  %537 = vmatpush.msrb.mxu0 %v516_v8  ;;  %v589_v7 = vld [vmem:[%s861_s5 + $0x58] sm:$0xff]  ;;  %v588_v8 = vld [vmem:[%s861_s5 + $0x50] sm:$0xff] }
  0x74   :  { %455 = vmatmul.f32.vlgmr.msra.gmra.mxu1 %v768_v2  ;;  %v505_v2 = vld [vmem:[#allocation5 + $0x20] sm:$0xff]  ;;  %598 = vmatpush.msrb.mxu2 %v593_v3 }
  0x75   :  { %538 = vmatpush.msrb.mxu0 %v515_v9  ;;  %557 = vmatpush.msrb.mxu1 %v532_v20  ;;  %v587_v9 = vld [vmem:[%s861_s5 + $0x48] sm:$0xff] }
  0x76   :  { %599 = vmatpush.msrb.mxu2 %v592_v4 }
  0x77   :  { %539 = vmatpush.msrb.mxu0 %v514_v10  ;;  %558 = vmatpush.msrb.mxu1 %v531_v22  ;;  %v586_v10 = vld [vmem:[%s861_s5 + $0x40] sm:$0xff] }
  0x78   :  { %600 = vmatpush.msrb.mxu2 %v591_v5 }
  0x79   :  { %540 = vmatpush.msrb.mxu0 %v513_v11  ;;  %559 = vmatpush.msrb.mxu1 %v530_v24  ;;  %v585_v11 = vld [vmem:[%s861_s5 + $0x38] sm:$0xff] }
  0x7a   :  { %601 = vmatpush.msrb.mxu2 %v590_v6 }
  0x7b   :  { %541 = vmatpush.msrb.mxu0 %v512_v12  ;;  %560 = vmatpush.msrb.mxu1 %v529_v25  ;;  %v584_v12 = vld [vmem:[%s861_s5 + $0x30] sm:$0xff] }
  0x7c   :  { %602 = vmatpush.msrb.mxu2 %v589_v7 }
  0x7d   :  { %542 = vmatpush.msrb.mxu0 %v511_v13  ;;  %561 = vmatpush.msrb.mxu1 %v528_v26  ;;  %v583_v13 = vld [vmem:[%s861_s5 + $0x28] sm:$0xff] }
  0x7e   :  { %603 = vmatpush.msrb.mxu2 %v588_v8 }
  0x7f   :  { %543 = vmatpush.msrb.mxu0 %v510_v14  ;;  %562 = vmatpush.msrb.mxu1 %v527_v27  ;;  %v582_v14 = vld [vmem:[%s861_s5 + $0x20] sm:$0xff] }
  0x80   :  { %604 = vmatpush.msrb.mxu2 %v587_v9 }
  0x81   :  { %544 = vmatpush.msrb.mxu0 %v509_v15  ;;  %563 = vmatpush.msrb.mxu1 %v526_v28  ;;  %v581_v15 = vld [vmem:[%s861_s5 + $0x18] sm:$0xff] }
  0x82   :  { %605 = vmatpush.msrb.mxu2 %v586_v10 }
  0x83   :  { %545 = vmatpush.msrb.mxu0 %v508_v60  ;;  %564 = vmatpush.msrb.mxu1 %v525_v29  ;;  %v580_v60 = vld [vmem:[%s861_s5 + $0x10] sm:$0xff] }
  0x84   :  { %606 = vmatpush.msrb.mxu2 %v585_v11 }
  0x85   :  { %546 = vmatpush.msrb.mxu0 %v507_v16  ;;  %565 = vmatpush.msrb.mxu1 %v524_v31  ;;  %v579_v16 = vld [vmem:[%s861_s5 + $0x8] sm:$0xff] }
  0x86   :  { %607 = vmatpush.msrb.mxu2 %v584_v12 }
  0x87   :  { %547 = vmatpush.msrb.mxu0 %v506_v17  ;;  %566 = vmatpush.msrb.mxu1 %v523_v34  ;;  %v578_v17 = vld [vmem:[%s861_s5] sm:$0xff] }
  0x88   :  { %608 = vmatpush.msrb.mxu2 %v583_v13 }
  0x89   :  { %548 = vmatpush.msrb.mxu0 %v505_v2  ;;  %567 = vmatpush.msrb.mxu1 %v522_v35  ;;  %v642_v2 = vld [vmem:[%s860_s4] ss:$0 sm:$0xff] }
  0x8a   :  { %609 = vmatpush.msrb.mxu2 %v582_v14 }
  0x8b   :  { %549 = vmatpush.msrb.mxu0 %v504_v18  ;;  %568 = vmatpush.msrb.mxu1 %v521_v39 }
  0x8c   :  { %610 = vmatpush.msrb.mxu2 %v581_v15 }
  0x8d   :  { %550 = vmatpush.msrb.mxu0 %v503_v19  ;;  %569 = vmatpush.msrb.mxu1 %v520_v42 }
  0x8e   :  { %611 = vmatpush.msrb.mxu2 %v580_v60 }
  0x8f   :  { %551 = vmatpush.msrb.mxu0 %v502_v21  ;;  %570 = vmatpush.msrb.mxu1 %v519_v44 }
  0x90   :  { %612 = vmatpush.msrb.mxu2 %v579_v16 }
  0x91   :  { %552 = vmatpush.msrb.mxu0 %v501_v23  ;;  %571 = vmatpush.msrb.mxu1 %v518_v47  ;;  %v643_v23 = vld [vmem:[%s862_s6] ss:$0 sm:$0xff] }
  0x92   :  { %613 = vmatpush.msrb.mxu2 %v578_v17 }
  0x93   :  { %572 = vmatpush.msrb.mxu1 %v517_v50 }
  0xcb   :  { %v276_v32 = vpop.f32.mrf.mxu0 }
  0xcc   :  { %v277_v33 = vadd.f32 %v276_v32, %v258_v30 }
  0xcf   :  { %v296_v36 = vpop.f32.mrf.mxu1  ;;  %v316_v37 = vpop.f32.mrf.mxu2 }
  0xd0   :  { %v297_v38 = vadd.f32 %v296_v36, %v277_v33 }
  0xd2   :  { %v317_v40 = vadd.f32 %v316_v37, %v297_v38  ;;  %v336_v41 = vpop.f32.mrf.mxu3 }
  0xd4   :  { %v337_v43 = vadd.f32 %v336_v41, %v317_v40 }
  0xd5   :  { %v356_v45 = vpop.f32.mrf.mxu0 }
  0xd6   :  { %v357_v46 = vadd.f32 %v356_v45, %v337_v43 }
  0xd7   :  { %v376_v48 = vpop.f32.mrf.mxu1 }
  0xd8   :  { %v377_v49 = vadd.f32 %v376_v48, %v357_v46 }
  0xda   :  { %v499_v51 = vmax.f32 %v377_v49, 0.0 }
  0xdc   :  { %553 = vmatmul.f32.vlgmr.msrb.gmra.mxu0 %v499_v51 }
  0xea   :  { %v396_v52 = vpop.f32.mrf.mxu2 }
  0xeb   :  { %v397_v53 = vadd.f32 %v396_v52, %v258_v30 }
  0xed   :  { %v416_v54 = vpop.f32.mrf.mxu3 }
  0xee   :  { %v417_v55 = vadd.f32 %v416_v54, %v397_v53 }
  0xef   :  { %v436_v56 = vpop.f32.mrf.mxu0 }
  0xf0   :  { %v437_v57 = vadd.f32 %v436_v56, %v417_v55 }
  0xf1   :  { %v456_v58 = vpop.f32.mrf.mxu1 }
  0xf2   :  { %v457_v59 = vadd.f32 %v456_v58, %v437_v57 }
  0xf3   :  { %v476_v61 = vpop.f32.mrf.mxu2 }
  0xf4   :  { %v477_v62 = vadd.f32 %v476_v61, %v457_v59 }
  0xf5   :  { %v496_v63 = vpop.f32.mrf.mxu3 }
  0xf6   :  { %v497_v0 = vadd.f32 %v496_v63, %v477_v62 }
  0xf8   :  { %v500_v1 = vmax.f32 %v497_v0, 0.0 }
  0xfa   :  { %573 = vmatmul.f32.vlgmr.msrb.gmra.mxu1 %v500_v1 }
 0x159   :  { %v554_v18 = vpop.f32.mrf.mxu0 }
 0x15a   :  { %v555_v19 = vadd.f32 %v642_v2, %v554_v18 }
 0x177   :  { %v574_v20 = vpop.f32.mrf.mxu1 }
 0x178   :  { %v575_v21 = vadd.f32 %v574_v20, %v555_v19 }
 0x17a   :  { %644 = vtanh.f32 %v575_v21 }
 0x180   :  { %v645_v22 = vpop.eup %644 }
 0x181   :  { %614 = vmatmul.f32.vlgmr.msrb.gmra.mxu2 %v645_v22 }
 0x204   :  { %v615_v24 = vpop.f32.mrf.mxu2 }
 0x205   :  { %v616_v25 = vadd.f32 %v643_v23, %v615_v24 }
 0x207   :  { %618 = vmax.xlane.f32.xlu0 %v616_v25 }
 0x27a   :  { %v619_v26 = vpop.xlane.xlu0 %618 }
 0x27b   :  { %v620_v27 = vsub.f32 %v616_v25, %v619_v26 }
 0x27d   :  { %v621_v28 = vmul.f32 1.442695, %v620_v27 }
 0x27f   :  { %646 = vpow2.f32 %v621_v28 }
 0x285   :  { %v647_v29 = vpop.eup %646 }
 0x286   :  { %623 = vadd.xlane.f32.xlu0 %v647_v29 }
 0x2f9   :  { %v624_v30 = vpop.xlane.xlu0 %623 }
 0x2fa   :  { %648 = vlog2.f32 %v624_v30 }
 0x300   :  { %v649_v31 = vpop.eup %648 }
 0x301   :  { %v626_v32 = vmul.f32 0.6931472, %v649_v31 }
 0x303   :  { %v627_v33 = vadd.f32 %v626_v32, %v619_v26 }
 0x305   :  { %v628_v34 = vsub.f32 %v616_v25, %v627_v33 }
 0x307   :  { %629 = vst [vmem:[%s863_s7] sm:$0xff] %v628_v34 }
 0x308   :  { %634 = vsyncpa [#allocation4], 1 }
 0x309   :  { %635 = vsyncpa [#allocation6], 1 }

</bundles_post_ra>
